<compile_context>
chip_gen: v7x
topology: tpu7x:2x2x1
jax: 0.10.0
libtpu: 0.0.40
codegen_flags: <defaults>
</compile_context>

<pallas_src>
import jax
import jax.numpy as jnp
from jax import lax
from jax.experimental import pallas as pl
from jax.experimental.pallas import tpu as pltpu

INPUT_DIM = 4      # [Upper_band, Lower_band, price_position, band_width]
CIN_PAD = 8        # conv input channels padded to 8 lanes (zero-filled)
CONV_OUT = 64      # Conv1d out channels
KERNEL = 4         # Conv1d kernel_size
HIDDEN = 64        # LSTM hidden_dim
OUTPUT_DIM = 2     # fc output
FC_PAD = 128       # fc output padded to a full lane-vreg (lane-dense store)
SLAB = 2 * HIDDEN + FC_PAD   # packed output: [h | c | fc(padded)] = 256 lanes


def market_classifier_kernel(x_ref, convw_ref, convb_ref,
                             wih_ref, whh_ref, bias_ref,
                             fcw_ref, fcb_ref,
                             out_ref, gx_ref):
    # x_ref    : (T*B_pad, CIN_PAD) f32, row = t*B_pad + b, lanes >= 4 are zero
    # convw_ref: (KERNEL, CIN_PAD, 64) bf16, convw[k, c, o] = conv_w[o, c, k]
    # convb_ref: (1, 64) f32
    # wih_ref  : (64, 4H)  bf16, gate cols ordered [o | f | g | i]
    # whh_ref  : (2H, 4H)  bf16, rows 64:128 (c half of packed state) are zero
    # bias_ref : (1, 4H)   f32, b_ih + b_hh reordered [o | f | g | i]
    # fcw_ref  : (2H, FC_PAD) bf16, rows 64:128 zero, cols >= 2 zero
    # fcb_ref  : (1, FC_PAD) f32
    # out_ref  : (B_pad, SLAB) f32, [h | c | fc(padded)]
    # gx_ref   : (T_out*B_pad, 4H) f32 scratch for the hoisted input projection
    B_pad = out_ref.shape[0]
    H = HIDDEN
    T_out = gx_ref.shape[0] // B_pad
    n_rows = T_out * B_pad

    # ---- Conv1d(4->64, k=4) + ReLU: 4 per-tap matmuls summed (no im2col dup) -
    conv = jnp.zeros((n_rows, CONV_OUT), jnp.float32)
    for k in range(KERNEL):                       # static, unrolled at trace time
        # rows [(t+k)*B_pad + b] for t in [0, T_out): 8-sublane-aligned slice.
        xk = x_ref[pl.ds(k * B_pad, n_rows), :]
        conv = conv + jnp.dot(xk.astype(jnp.bfloat16), convw_ref[k],
                              preferred_element_type=jnp.float32)
    conv = jnp.maximum(conv + convb_ref[...], 0.0)          # (T_out*B_pad, 64)
    # TODO(synk): nn.Dropout(0.5) is identity at inference; training-mode
    # stochastic dropout is not implemented here.

    # ---- hoist the LSTM input projection (+ combined bias) out of the loop --
    # bias is zero under this module's init but kept for trained-weight loads;
    # it is added once here, off the recurrence critical path.
    gx_ref[...] = (jnp.dot(conv.astype(jnp.bfloat16), wih_ref[...],
                           preferred_element_type=jnp.float32)
                   + bias_ref[...])                         # (T_out*B_pad, 4H)

    # ---- single-layer unidirectional LSTM on a packed [h | c] 128-lane state -
    # (the PyTorch forward never passes hidden_state into self.lstm -> zeros)
    whh = whh_ref[...]                                      # (2H, 4H) bf16
    lane = lax.broadcasted_iota(jnp.int32, (B_pad, 2 * H), 1)
    is_h = lane < H                                         # hoisted out of loop

    def step(t, state):                                     # state = [h | c]
        row = pl.multiple_of(t * B_pad, B_pad)              # 8-aligned gx rows
        gates = gx_ref[pl.ds(row, B_pad), :] + jnp.dot(
            state.astype(jnp.bfloat16), whh,
            preferred_element_type=jnp.float32)             # (B_pad, 4H) [o f g i]
        sof = jax.nn.sigmoid(gates[:, :2 * H])              # [sig(o) | sig(f)]
        gi = gates[:, 2 * H:]                               # [g_pre  | i_pre ]
        mixed = jnp.where(is_h, jnp.tanh(gi),
                          jax.nn.sigmoid(gi))               # [tanh(g)| sig(i)]
        ig = mixed * pltpu.roll(mixed, H, axis=1)           # both halves sig(i)*tanh(g)
        cand = sof * state + ig                             # c half = new c
        hnew = sof * pltpu.roll(jnp.tanh(cand), H, axis=1)  # h half = sig(o)*tanh(c')
        return jnp.where(is_h, hnew, cand)                  # packed [h' | c']

    state0 = jnp.zeros((B_pad, 2 * H), jnp.float32)
    # unroll=True is fine for small T_out; switch to partial unroll (4 or 8)
    # if T_out grows past a few dozen steps.
    state = lax.fori_loop(0, T_out, step, state0, unroll=True)

    # ---- fc on last h (c rows of fcw are zero) + lane-dense packed epilogue --
    logits = (jnp.dot(state.astype(jnp.bfloat16), fcw_ref[...],
                      preferred_element_type=jnp.float32)
              + fcb_ref[...])                               # (B_pad, FC_PAD)
    out_ref[:, :2 * H] = state                              # one 128-lane store
    out_ref[:, 2 * H:] = logits                             # one 128-lane store


@jax.jit
def market_classifier_forward(x, convw, convb, wih, whh, bias, fcw, fcb):
    """x: (B, T, INPUT_DIM) float32 (batch_first, same as the PyTorch input)."""
    B, T, Cin = x.shape
    if T < KERNEL:
        raise ValueError(f"sequence length {T} must be >= kernel_size {KERNEL}")
    T_out = T - KERNEL + 1
    B_pad = ((B + 7) // 8) * 8
    n_rows = T_out * B_pad

    # Layout plumbing only: one transpose + zero-pad copy (no 4x im2col dup).
    x_t = jnp.transpose(x, (1, 0, 2))                       # (T, B, Cin)
    x_t = jnp.pad(x_t, ((0, 0), (0, B_pad - B), (0, CIN_PAD - Cin)))
    x2 = x_t.reshape(T * B_pad, CIN_PAD)                    # (T*B_pad, CIN_PAD)

    args = (x2, convw, convb, wih, whh, bias, fcw, fcb)
    in_bytes = sum(int(a.size) * a.dtype.itemsize for a in args)
    cost = pl.CostEstimate(
        flops=int(2 * n_rows * CIN_PAD * CONV_OUT * KERNEL
                  + 2 * n_rows * CONV_OUT * 4 * HIDDEN
                  + 2 * n_rows * (2 * HIDDEN) * (4 * HIDDEN)
                  + 2 * B_pad * (2 * HIDDEN) * FC_PAD
                  + 12 * n_rows * (2 * HIDDEN)),
        transcendentals=int(n_rows * 8 * HIDDEN),
        bytes_accessed=int(in_bytes + B_pad * SLAB * 4
                           + 2 * n_rows * 4 * HIDDEN * 4),
    )

    vmem = pl.BlockSpec(memory_space=pltpu.MemorySpace.VMEM)
    slab = pl.pallas_call(
        market_classifier_kernel,
        out_shape=jax.ShapeDtypeStruct((B_pad, SLAB), jnp.float32),
        in_specs=[vmem] * 8,
        out_specs=vmem,
        scratch_shapes=[pltpu.VMEM((n_rows, 4 * HIDDEN), jnp.float32)],
        compiler_params=pltpu.CompilerParams(vmem_limit_bytes=32 * 1024 * 1024),
        cost_estimate=cost,
    )(*args)

    h_n = slab[:B, 0:HIDDEN]
    c_n = slab[:B, HIDDEN:2 * HIDDEN]
    out = slab[:B, 2 * HIDDEN:2 * HIDDEN + OUTPUT_DIM]
    # PyTorch returns h_n, c_n with shape (num_layers*num_directions, B, H).
    return out, (h_n[None], c_n[None])


# ----------------------------- parameter handling -----------------------------

def _xavier_normal(key, shape, fan_in, fan_out):
    std = (2.0 / (fan_in + fan_out)) ** 0.5
    return std * jax.random.normal(key, shape, jnp.float32)


def init_params(key):
    """Raw parameters in PyTorch layouts / init (xavier weights, zero LSTM/conv
    biases, default Linear init for fc)."""
    k1, k2, k3, k4a, k4b = jax.random.split(key, 5)
    conv_w = _xavier_normal(k1, (CONV_OUT, INPUT_DIM, KERNEL),
                            INPUT_DIM * KERNEL, CONV_OUT * KERNEL)
    conv_b = jnp.zeros((CONV_OUT,), jnp.float32)
    w_ih = _xavier_normal(k2, (4 * HIDDEN, CONV_OUT), CONV_OUT, 4 * HIDDEN)
    w_hh = _xavier_normal(k3, (4 * HIDDEN, HIDDEN), HIDDEN, 4 * HIDDEN)
    b_ih = jnp.zeros((4 * HIDDEN,), jnp.float32)
    b_hh = jnp.zeros((4 * HIDDEN,), jnp.float32)
    bound = 1.0 / (HIDDEN ** 0.5)
    fc_w = jax.random.uniform(k4a, (OUTPUT_DIM, HIDDEN), jnp.float32, -bound, bound)
    fc_b = jax.random.uniform(k4b, (OUTPUT_DIM,), jnp.float32, -bound, bound)
    return conv_w, conv_b, w_ih, w_hh, b_ih, b_hh, fc_w, fc_b


def pack_params(raw):
    """PyTorch-layout params -> kernel layouts (gate reorder [o|f|g|i], zero row
    padding for the packed [h|c] state, bf16 MXU operands)."""
    conv_w, conv_b, w_ih, w_hh, b_ih, b_hh, fc_w, fc_b = raw

    convw = jnp.zeros((KERNEL, CIN_PAD, CONV_OUT), jnp.float32)
    convw = convw.at[:, :INPUT_DIM, :].set(jnp.transpose(conv_w, (2, 1, 0)))
    convw = convw.astype(jnp.bfloat16)
    convb = conv_b.reshape(1, CONV_OUT).astype(jnp.float32)

    def reorder_w(w):   # torch rows [i,f,g,o] -> (in, 4H) with cols [o,f,g,i]
        i, f, g, o = jnp.split(w, 4, axis=0)
        return jnp.concatenate([o, f, g, i], axis=0).T

    def reorder_b(b):
        i, f, g, o = jnp.split(b, 4)
        return jnp.concatenate([o, f, g, i])

    wih = reorder_w(w_ih).astype(jnp.bfloat16)                      # (64, 4H)
    whh = jnp.zeros((2 * HIDDEN, 4 * HIDDEN), jnp.float32)
    whh = whh.at[:HIDDEN].set(reorder_w(w_hh)).astype(jnp.bfloat16)  # (2H, 4H)
    bias = (reorder_b(b_ih) + reorder_b(b_hh)).reshape(1, 4 * HIDDEN)
    bias = bias.astype(jnp.float32)

    fcw = jnp.zeros((2 * HIDDEN, FC_PAD), jnp.float32)
    fcw = fcw.at[:HIDDEN, :OUTPUT_DIM].set(fc_w.T).astype(jnp.bfloat16)
    fcb = jnp.zeros((1, FC_PAD), jnp.float32).at[0, :OUTPUT_DIM].set(fc_b)
    return convw, convb, wih, whh, bias, fcw, fcb


# --------------------------- pure-JAX f32 reference ---------------------------

def reference_forward(x, raw):
    conv_w, conv_b, w_ih, w_hh, b_ih, b_hh, fc_w, fc_b = raw
    B, T, _ = x.shape
    T_out = T - KERNEL + 1
    xt = jnp.transpose(x, (0, 2, 1))                        # (B, Cin, T)
    taps = jnp.stack([xt[:, :, k:k + T_out] for k in range(KERNEL)], axis=-1)
    conv = jnp.einsum('bctk,ock->bto', taps, conv_w) + conv_b
    seq = jnp.maximum(conv, 0.0)                            # (B, T_out, 64)
    H = HIDDEN

    def cell(carry, x_t):
        h, c = carry
        gates = x_t @ w_ih.T + h @ w_hh.T + b_ih + b_hh     # torch order [i,f,g,o]
        i = jax.nn.sigmoid(gates[:, :H])
        f = jax.nn.sigmoid(gates[:, H:2 * H])
        g = jnp.tanh(gates[:, 2 * H:3 * H])
        o = jax.nn.sigmoid(gates[:, 3 * H:])
        c = f * c + i * g
        h = o * jnp.tanh(c)
        return (h, c), None

    init = (jnp.zeros((B, H), jnp.float32), jnp.zeros((B, H), jnp.float32))
    (h, c), _ = lax.scan(cell, init, jnp.transpose(seq, (1, 0, 2)))
    out = h @ fc_w.T + fc_b
    return out, (h[None], c[None])


if __name__ == "__main__":
    key = jax.random.PRNGKey(0)
    kx, kp = jax.random.split(key)

    B, T = 2, 8                                             # small test shapes
    x = jax.random.normal(kx, (B, T, INPUT_DIM), jnp.float32)

    raw = init_params(kp)
    packed = pack_params(raw)

    output, (h_n, c_n) = market_classifier_forward(x, *packed)
    jax.block_until_ready((output, h_n, c_n))

    assert output.shape == (B, OUTPUT_DIM)
    assert h_n.shape == (1, B, HIDDEN) and c_n.shape == (1, B, HIDDEN)

    # Sanity check vs pure-JAX f32 reference (loose tol: bf16 MXU operands).
    ref_out, (ref_h, ref_c) = reference_forward(x, raw)
    err = max(float(jnp.max(jnp.abs(output - ref_out))),
              float(jnp.max(jnp.abs(h_n - ref_h))),
              float(jnp.max(jnp.abs(c_n - ref_c))))
    assert err < 2e-2, f"kernel/reference mismatch: max abs err = {err}"

    print("KERNEL_OK")
</pallas_src>

<mosaic_0001>
module attributes {stable_mosaic.version = 11 : i64} {
  func.func @market_classifier_kernel(%arg0: memref<64x8xf32, #tpu.memory_space<vmem>>, %arg1: memref<4x8x64xbf16, #tpu.memory_space<vmem>>, %arg2: memref<1x64xf32, #tpu.memory_space<vmem>>, %arg3: memref<64x256xbf16, #tpu.memory_space<vmem>>, %arg4: memref<128x256xbf16, #tpu.memory_space<vmem>>, %arg5: memref<1x256xf32, #tpu.memory_space<vmem>>, %arg6: memref<128x128xbf16, #tpu.memory_space<vmem>>, %arg7: memref<1x128xf32, #tpu.memory_space<vmem>>, %arg8: memref<8x256xf32, #tpu.memory_space<vmem>>, %arg9: memref<40x256xf32, #tpu.memory_space<vmem>>) attributes {dimension_semantics = [], scalar_prefetch = 0 : i64, scratch_operands = 1 : i64, tpu.core_type = #tpu.core_type<tc>} {
    %cst = arith.constant 0.000000e+00 : f32
    %0 = vector.broadcast %cst : f32 to vector<40x64xf32>
    %c0 = arith.constant 0 : index
    %c0_0 = arith.constant 0 : index
    %1 = vector.load %arg0[%c0, %c0_0] : memref<64x8xf32, #tpu.memory_space<vmem>>, vector<40x8xf32>
    %2 = arith.truncf %1 : vector<40x8xf32> to vector<40x8xbf16>
    %c0_1 = arith.constant 0 : index
    %c0_2 = arith.constant 0 : index
    %c0_3 = arith.constant 0 : index
    %3 = vector.load %arg1[%c0_1, %c0_2, %c0_3] : memref<4x8x64xbf16, #tpu.memory_space<vmem>>, vector<1x8x64xbf16>
    %4 = vector.shape_cast %3 : vector<1x8x64xbf16> to vector<8x64xbf16>
    %cst_4 = arith.constant dense<0.000000e+00> : vector<40x64xf32>
    %5 = tpu.matmul %2, %4, %cst_4 {dimension_numbers = #tpu.dot_dimension_numbers<[1], [0], [0], [1], [0, 0, 1, 1], [], []>} : vector<40x8xbf16>, vector<8x64xbf16>, vector<40x64xf32> -> vector<40x64xf32>
    %6 = arith.addf %0, %5 : vector<40x64xf32>
    %c8 = arith.constant 8 : index
    %c0_5 = arith.constant 0 : index
    %7 = vector.load %arg0[%c8, %c0_5] : memref<64x8xf32, #tpu.memory_space<vmem>>, vector<40x8xf32>
    %8 = arith.truncf %7 : vector<40x8xf32> to vector<40x8xbf16>
    %c1 = arith.constant 1 : index
    %c0_6 = arith.constant 0 : index
    %c0_7 = arith.constant 0 : index
    %9 = vector.load %arg1[%c1, %c0_6, %c0_7] : memref<4x8x64xbf16, #tpu.memory_space<vmem>>, vector<1x8x64xbf16>
    %10 = vector.shape_cast %9 : vector<1x8x64xbf16> to vector<8x64xbf16>
    %cst_8 = arith.constant dense<0.000000e+00> : vector<40x64xf32>
    %11 = tpu.matmul %8, %10, %cst_8 {dimension_numbers = #tpu.dot_dimension_numbers<[1], [0], [0], [1], [0, 0, 1, 1], [], []>} : vector<40x8xbf16>, vector<8x64xbf16>, vector<40x64xf32> -> vector<40x64xf32>
    %12 = arith.addf %6, %11 : vector<40x64xf32>
    %c16 = arith.constant 16 : index
    %c0_9 = arith.constant 0 : index
    %13 = vector.load %arg0[%c16, %c0_9] : memref<64x8xf32, #tpu.memory_space<vmem>>, vector<40x8xf32>
    %14 = arith.truncf %13 : vector<40x8xf32> to vector<40x8xbf16>
    %c2 = arith.constant 2 : index
    %c0_10 = arith.constant 0 : index
    %c0_11 = arith.constant 0 : index
    %15 = vector.load %arg1[%c2, %c0_10, %c0_11] : memref<4x8x64xbf16, #tpu.memory_space<vmem>>, vector<1x8x64xbf16>
    %16 = vector.shape_cast %15 : vector<1x8x64xbf16> to vector<8x64xbf16>
    %cst_12 = arith.constant dense<0.000000e+00> : vector<40x64xf32>
    %17 = tpu.matmul %14, %16, %cst_12 {dimension_numbers = #tpu.dot_dimension_numbers<[1], [0], [0], [1], [0, 0, 1, 1], [], []>} : vector<40x8xbf16>, vector<8x64xbf16>, vector<40x64xf32> -> vector<40x64xf32>
    %18 = arith.addf %12, %17 : vector<40x64xf32>
    %c24 = arith.constant 24 : index
    %c0_13 = arith.constant 0 : index
    %19 = vector.load %arg0[%c24, %c0_13] : memref<64x8xf32, #tpu.memory_space<vmem>>, vector<40x8xf32>
    %20 = arith.truncf %19 : vector<40x8xf32> to vector<40x8xbf16>
    %c3 = arith.constant 3 : index
    %c0_14 = arith.constant 0 : index
    %c0_15 = arith.constant 0 : index
    %21 = vector.load %arg1[%c3, %c0_14, %c0_15] : memref<4x8x64xbf16, #tpu.memory_space<vmem>>, vector<1x8x64xbf16>
    %22 = vector.shape_cast %21 : vector<1x8x64xbf16> to vector<8x64xbf16>
    %cst_16 = arith.constant dense<0.000000e+00> : vector<40x64xf32>
    %23 = tpu.matmul %20, %22, %cst_16 {dimension_numbers = #tpu.dot_dimension_numbers<[1], [0], [0], [1], [0, 0, 1, 1], [], []>} : vector<40x8xbf16>, vector<8x64xbf16>, vector<40x64xf32> -> vector<40x64xf32>
    %24 = arith.addf %18, %23 : vector<40x64xf32>
    %c0_17 = arith.constant 0 : index
    %c0_18 = arith.constant 0 : index
    %25 = vector.load %arg2[%c0_17, %c0_18] : memref<1x64xf32, #tpu.memory_space<vmem>>, vector<1x64xf32>
    %26 = vector.broadcast %25 : vector<1x64xf32> to vector<40x64xf32>
    %27 = arith.addf %24, %26 : vector<40x64xf32>
    %cst_19 = arith.constant 0.000000e+00 : f32
    %28 = vector.broadcast %cst_19 : f32 to vector<40x64xf32>
    %29 = arith.maximumf %27, %28 : vector<40x64xf32>
    %30 = arith.truncf %29 : vector<40x64xf32> to vector<40x64xbf16>
    %c0_20 = arith.constant 0 : index
    %c0_21 = arith.constant 0 : index
    %31 = vector.load %arg3[%c0_20, %c0_21] : memref<64x256xbf16, #tpu.memory_space<vmem>>, vector<64x256xbf16>
    %cst_22 = arith.constant dense<0.000000e+00> : vector<40x256xf32>
    %32 = tpu.matmul %30, %31, %cst_22 {dimension_numbers = #tpu.dot_dimension_numbers<[1], [0], [0], [1], [0, 0, 1, 1], [], []>} : vector<40x64xbf16>, vector<64x256xbf16>, vector<40x256xf32> -> vector<40x256xf32>
    %c0_23 = arith.constant 0 : index
    %c0_24 = arith.constant 0 : index
    %33 = vector.load %arg5[%c0_23, %c0_24] : memref<1x256xf32, #tpu.memory_space<vmem>>, vector<1x256xf32>
    %34 = vector.broadcast %33 : vector<1x256xf32> to vector<40x256xf32>
    %35 = arith.addf %32, %34 : vector<40x256xf32>
    %c0_25 = arith.constant 0 : index
    %c0_26 = arith.constant 0 : index
    %36 = vector.load %arg9[%c0_25, %c0_26] : memref<40x256xf32, #tpu.memory_space<vmem>>, vector<40x256xf32>
    tpu.vector_store %arg9[%c0_25, %c0_26], %35 {strides = array<i32>} : memref<40x256xf32, #tpu.memory_space<vmem>>, vector<40x256xf32>,
    %c0_27 = arith.constant 0 : index
    %c0_28 = arith.constant 0 : index
    %37 = vector.load %arg4[%c0_27, %c0_28] : memref<128x256xbf16, #tpu.memory_space<vmem>>, vector<128x256xbf16>
    %38 = tpu.iota {dimensions = array<i32: 1>} : vector<8x128xi32>
    %c64_i32 = arith.constant 64 : i32
    %39 = vector.broadcast %c64_i32 : i32 to vector<8x128xi32>
    %40 = arith.cmpi slt, %38, %39 : vector<8x128xi32>
    %cst_29 = arith.constant 0.000000e+00 : f32
    %41 = vector.broadcast %cst_29 : f32 to vector<8x128xf32>
    %c0_i32 = arith.constant 0 : i32
    %c8_i32 = arith.constant 8 : i32
    %42 = arith.muli %c0_i32, %c8_i32 : i32
    %43 = tpu.assume_multiple %42, 8 : i32
    %44 = arith.index_cast %43 : i32 to index
    %c0_30 = arith.constant 0 : index
    %45 = vector.load %arg9[%44, %c0_30] : memref<40x256xf32, #tpu.memory_space<vmem>>, vector<8x256xf32>
    %46 = arith.truncf %41 : vector<8x128xf32> to vector<8x128xbf16>
    %cst_31 = arith.constant dense<0.000000e+00> : vector<8x256xf32>
    %47 = tpu.matmul %46, %37, %cst_31 {dimension_numbers = #tpu.dot_dimension_numbers<[1], [0], [0], [1], [0, 0, 1, 1], [], []>} : vector<8x128xbf16>, vector<128x256xbf16>, vector<8x256xf32> -> vector<8x256xf32>
    %48 = arith.addf %45, %47 : vector<8x256xf32>
    %49 = vector.extract_strided_slice %48 {offsets = [0, 0], sizes = [8, 128], strides = [1, 1]} : vector<8x256xf32> to vector<8x128xf32>
    %50 = arith.negf %49 : vector<8x128xf32>
    %51 = math.exp %50 : vector<8x128xf32>
    %cst_32 = arith.constant 1.000000e+00 : f32
    %52 = vector.broadcast %cst_32 : f32 to vector<8x128xf32>
    %53 = arith.addf %52, %51 : vector<8x128xf32>
    %54 = arith.divf %52, %53 : vector<8x128xf32>
    %55 = vector.extract_strided_slice %48 {offsets = [0, 128], sizes = [8, 128], strides = [1, 1]} : vector<8x256xf32> to vector<8x128xf32>
    %56 = math.tanh %55 : vector<8x128xf32>
    %57 = arith.negf %55 : vector<8x128xf32>
    %58 = math.exp %57 : vector<8x128xf32>
    %cst_33 = arith.constant 1.000000e+00 : f32
    %59 = vector.broadcast %cst_33 : f32 to vector<8x128xf32>
    %60 = arith.addf %59, %58 : vector<8x128xf32>
    %61 = arith.divf %59, %60 : vector<8x128xf32>
    %62 = arith.select %40, %56, %61 : vector<8x128xi1>, vector<8x128xf32>
    %c64_i32_34 = arith.constant 64 : i32
    %63 = tpu.dynamic_rotate %62 by %c64_i32_34 dim 1 : vector<8x128xf32>, i32 -> vector<8x128xf32>
    %64 = arith.mulf %62, %63 : vector<8x128xf32>
    %65 = arith.mulf %54, %41 : vector<8x128xf32>
    %66 = arith.addf %65, %64 : vector<8x128xf32>
    %67 = math.tanh %66 : vector<8x128xf32>
    %c64_i32_35 = arith.constant 64 : i32
    %68 = tpu.dynamic_rotate %67 by %c64_i32_35 dim 1 : vector<8x128xf32>, i32 -> vector<8x128xf32>
    %69 = arith.mulf %54, %68 : vector<8x128xf32>
    %70 = arith.select %40, %69, %66 : vector<8x128xi1>, vector<8x128xf32>
    %c1_i32 = arith.constant 1 : i32
    %c8_i32_36 = arith.constant 8 : i32
    %71 = arith.muli %c1_i32, %c8_i32_36 : i32
    %72 = tpu.assume_multiple %71, 8 : i32
    %73 = arith.index_cast %72 : i32 to index
    %c0_37 = arith.constant 0 : index
    %74 = vector.load %arg9[%73, %c0_37] : memref<40x256xf32, #tpu.memory_space<vmem>>, vector<8x256xf32>
    %75 = arith.truncf %70 : vector<8x128xf32> to vector<8x128xbf16>
    %cst_38 = arith.constant dense<0.000000e+00> : vector<8x256xf32>
    %76 = tpu.matmul %75, %37, %cst_38 {dimension_numbers = #tpu.dot_dimension_numbers<[1], [0], [0], [1], [0, 0, 1, 1], [], []>} : vector<8x128xbf16>, vector<128x256xbf16>, vector<8x256xf32> -> vector<8x256xf32>
    %77 = arith.addf %74, %76 : vector<8x256xf32>
    %78 = vector.extract_strided_slice %77 {offsets = [0, 0], sizes = [8, 128], strides = [1, 1]} : vector<8x256xf32> to vector<8x128xf32>
    %79 = arith.negf %78 : vector<8x128xf32>
    %80 = math.exp %79 : vector<8x128xf32>
    %cst_39 = arith.constant 1.000000e+00 : f32
    %81 = vector.broadcast %cst_39 : f32 to vector<8x128xf32>
    %82 = arith.addf %81, %80 : vector<8x128xf32>
    %83 = arith.divf %81, %82 : vector<8x128xf32>
    %84 = vector.extract_strided_slice %77 {offsets = [0, 128], sizes = [8, 128], strides = [1, 1]} : vector<8x256xf32> to vector<8x128xf32>
    %85 = math.tanh %84 : vector<8x128xf32>
    %86 = arith.negf %84 : vector<8x128xf32>
    %87 = math.exp %86 : vector<8x128xf32>
    %cst_40 = arith.constant 1.000000e+00 : f32
    %88 = vector.broadcast %cst_40 : f32 to vector<8x128xf32>
    %89 = arith.addf %88, %87 : vector<8x128xf32>
    %90 = arith.divf %88, %89 : vector<8x128xf32>
    %91 = arith.select %40, %85, %90 : vector<8x128xi1>, vector<8x128xf32>
    %c64_i32_41 = arith.constant 64 : i32
    %92 = tpu.dynamic_rotate %91 by %c64_i32_41 dim 1 : vector<8x128xf32>, i32 -> vector<8x128xf32>
    %93 = arith.mulf %91, %92 : vector<8x128xf32>
    %94 = arith.mulf %83, %70 : vector<8x128xf32>
    %95 = arith.addf %94, %93 : vector<8x128xf32>
    %96 = math.tanh %95 : vector<8x128xf32>
    %c64_i32_42 = arith.constant 64 : i32
    %97 = tpu.dynamic_rotate %96 by %c64_i32_42 dim 1 : vector<8x128xf32>, i32 -> vector<8x128xf32>
    %98 = arith.mulf %83, %97 : vector<8x128xf32>
    %99 = arith.select %40, %98, %95 : vector<8x128xi1>, vector<8x128xf32>
    %c2_i32 = arith.constant 2 : i32
    %c8_i32_43 = arith.constant 8 : i32
    %100 = arith.muli %c2_i32, %c8_i32_43 : i32
    %101 = tpu.assume_multiple %100, 8 : i32
    %102 = arith.index_cast %101 : i32 to index
    %c0_44 = arith.constant 0 : index
    %103 = vector.load %arg9[%102, %c0_44] : memref<40x256xf32, #tpu.memory_space<vmem>>, vector<8x256xf32>
    %104 = arith.truncf %99 : vector<8x128xf32> to vector<8x128xbf16>
    %cst_45 = arith.constant dense<0.000000e+00> : vector<8x256xf32>
    %105 = tpu.matmul %104, %37, %cst_45 {dimension_numbers = #tpu.dot_dimension_numbers<[1], [0], [0], [1], [0, 0, 1, 1], [], []>} : vector<8x128xbf16>, vector<128x256xbf16>, vector<8x256xf32> -> vector<8x256xf32>
    %106 = arith.addf %103, %105 : vector<8x256xf32>
    %107 = vector.extract_strided_slice %106 {offsets = [0, 0], sizes = [8, 128], strides = [1, 1]} : vector<8x256xf32> to vector<8x128xf32>
    %108 = arith.negf %107 : vector<8x128xf32>
    %109 = math.exp %108 : vector<8x128xf32>
    %cst_46 = arith.constant 1.000000e+00 : f32
    %110 = vector.broadcast %cst_46 : f32 to vector<8x128xf32>
    %111 = arith.addf %110, %109 : vector<8x128xf32>
    %112 = arith.divf %110, %111 : vector<8x128xf32>
    %113 = vector.extract_strided_slice %106 {offsets = [0, 128], sizes = [8, 128], strides = [1, 1]} : vector<8x256xf32> to vector<8x128xf32>
    %114 = math.tanh %113 : vector<8x128xf32>
    %115 = arith.negf %113 : vector<8x128xf32>
    %116 = math.exp %115 : vector<8x128xf32>
    %cst_47 = arith.constant 1.000000e+00 : f32
    %117 = vector.broadcast %cst_47 : f32 to vector<8x128xf32>
    %118 = arith.addf %117, %116 : vector<8x128xf32>
    %119 = arith.divf %117, %118 : vector<8x128xf32>
    %120 = arith.select %40, %114, %119 : vector<8x128xi1>, vector<8x128xf32>
    %c64_i32_48 = arith.constant 64 : i32
    %121 = tpu.dynamic_rotate %120 by %c64_i32_48 dim 1 : vector<8x128xf32>, i32 -> vector<8x128xf32>
    %122 = arith.mulf %120, %121 : vector<8x128xf32>
    %123 = arith.mulf %112, %99 : vector<8x128xf32>
    %124 = arith.addf %123, %122 : vector<8x128xf32>
    %125 = math.tanh %124 : vector<8x128xf32>
    %c64_i32_49 = arith.constant 64 : i32
    %126 = tpu.dynamic_rotate %125 by %c64_i32_49 dim 1 : vector<8x128xf32>, i32 -> vector<8x128xf32>
    %127 = arith.mulf %112, %126 : vector<8x128xf32>
    %128 = arith.select %40, %127, %124 : vector<8x128xi1>, vector<8x128xf32>
    %c3_i32 = arith.constant 3 : i32
    %c8_i32_50 = arith.constant 8 : i32
    %129 = arith.muli %c3_i32, %c8_i32_50 : i32
    %130 = tpu.assume_multiple %129, 8 : i32
    %131 = arith.index_cast %130 : i32 to index
    %c0_51 = arith.constant 0 : index
    %132 = vector.load %arg9[%131, %c0_51] : memref<40x256xf32, #tpu.memory_space<vmem>>, vector<8x256xf32>
    %133 = arith.truncf %128 : vector<8x128xf32> to vector<8x128xbf16>
    %cst_52 = arith.constant dense<0.000000e+00> : vector<8x256xf32>
    %134 = tpu.matmul %133, %37, %cst_52 {dimension_numbers = #tpu.dot_dimension_numbers<[1], [0], [0], [1], [0, 0, 1, 1], [], []>} : vector<8x128xbf16>, vector<128x256xbf16>, vector<8x256xf32> -> vector<8x256xf32>
    %135 = arith.addf %132, %134 : vector<8x256xf32>
    %136 = vector.extract_strided_slice %135 {offsets = [0, 0], sizes = [8, 128], strides = [1, 1]} : vector<8x256xf32> to vector<8x128xf32>
    %137 = arith.negf %136 : vector<8x128xf32>
    %138 = math.exp %137 : vector<8x128xf32>
    %cst_53 = arith.constant 1.000000e+00 : f32
    %139 = vector.broadcast %cst_53 : f32 to vector<8x128xf32>
    %140 = arith.addf %139, %138 : vector<8x128xf32>
    %141 = arith.divf %139, %140 : vector<8x128xf32>
    %142 = vector.extract_strided_slice %135 {offsets = [0, 128], sizes = [8, 128], strides = [1, 1]} : vector<8x256xf32> to vector<8x128xf32>
    %143 = math.tanh %142 : vector<8x128xf32>
    %144 = arith.negf %142 : vector<8x128xf32>
    %145 = math.exp %144 : vector<8x128xf32>
    %cst_54 = arith.constant 1.000000e+00 : f32
    %146 = vector.broadcast %cst_54 : f32 to vector<8x128xf32>
    %147 = arith.addf %146, %145 : vector<8x128xf32>
    %148 = arith.divf %146, %147 : vector<8x128xf32>
    %149 = arith.select %40, %143, %148 : vector<8x128xi1>, vector<8x128xf32>
    %c64_i32_55 = arith.constant 64 : i32
    %150 = tpu.dynamic_rotate %149 by %c64_i32_55 dim 1 : vector<8x128xf32>, i32 -> vector<8x128xf32>
    %151 = arith.mulf %149, %150 : vector<8x128xf32>
    %152 = arith.mulf %141, %128 : vector<8x128xf32>
    %153 = arith.addf %152, %151 : vector<8x128xf32>
    %154 = math.tanh %153 : vector<8x128xf32>
    %c64_i32_56 = arith.constant 64 : i32
    %155 = tpu.dynamic_rotate %154 by %c64_i32_56 dim 1 : vector<8x128xf32>, i32 -> vector<8x128xf32>
    %156 = arith.mulf %141, %155 : vector<8x128xf32>
    %157 = arith.select %40, %156, %153 : vector<8x128xi1>, vector<8x128xf32>
    %c4_i32 = arith.constant 4 : i32
    %c8_i32_57 = arith.constant 8 : i32
    %158 = arith.muli %c4_i32, %c8_i32_57 : i32
    %159 = tpu.assume_multiple %158, 8 : i32
    %160 = arith.index_cast %159 : i32 to index
    %c0_58 = arith.constant 0 : index
    %161 = vector.load %arg9[%160, %c0_58] : memref<40x256xf32, #tpu.memory_space<vmem>>, vector<8x256xf32>
    %162 = arith.truncf %157 : vector<8x128xf32> to vector<8x128xbf16>
    %cst_59 = arith.constant dense<0.000000e+00> : vector<8x256xf32>
    %163 = tpu.matmul %162, %37, %cst_59 {dimension_numbers = #tpu.dot_dimension_numbers<[1], [0], [0], [1], [0, 0, 1, 1], [], []>} : vector<8x128xbf16>, vector<128x256xbf16>, vector<8x256xf32> -> vector<8x256xf32>
    %164 = arith.addf %161, %163 : vector<8x256xf32>
    %165 = vector.extract_strided_slice %164 {offsets = [0, 0], sizes = [8, 128], strides = [1, 1]} : vector<8x256xf32> to vector<8x128xf32>
    %166 = arith.negf %165 : vector<8x128xf32>
    %167 = math.exp %166 : vector<8x128xf32>
    %cst_60 = arith.constant 1.000000e+00 : f32
    %168 = vector.broadcast %cst_60 : f32 to vector<8x128xf32>
    %169 = arith.addf %168, %167 : vector<8x128xf32>
    %170 = arith.divf %168, %169 : vector<8x128xf32>
    %171 = vector.extract_strided_slice %164 {offsets = [0, 128], sizes = [8, 128], strides = [1, 1]} : vector<8x256xf32> to vector<8x128xf32>
    %172 = math.tanh %171 : vector<8x128xf32>
    %173 = arith.negf %171 : vector<8x128xf32>
    %174 = math.exp %173 : vector<8x128xf32>
    %cst_61 = arith.constant 1.000000e+00 : f32
    %175 = vector.broadcast %cst_61 : f32 to vector<8x128xf32>
    %176 = arith.addf %175, %174 : vector<8x128xf32>
    %177 = arith.divf %175, %176 : vector<8x128xf32>
    %178 = arith.select %40, %172, %177 : vector<8x128xi1>, vector<8x128xf32>
    %c64_i32_62 = arith.constant 64 : i32
    %179 = tpu.dynamic_rotate %178 by %c64_i32_62 dim 1 : vector<8x128xf32>, i32 -> vector<8x128xf32>
    %180 = arith.mulf %178, %179 : vector<8x128xf32>
    %181 = arith.mulf %170, %157 : vector<8x128xf32>
    %182 = arith.addf %181, %180 : vector<8x128xf32>
    %183 = math.tanh %182 : vector<8x128xf32>
    %c64_i32_63 = arith.constant 64 : i32
    %184 = tpu.dynamic_rotate %183 by %c64_i32_63 dim 1 : vector<8x128xf32>, i32 -> vector<8x128xf32>
    %185 = arith.mulf %170, %184 : vector<8x128xf32>
    %186 = arith.select %40, %185, %182 : vector<8x128xi1>, vector<8x128xf32>
    %c5_i32 = arith.constant 5 : i32
    %187 = arith.truncf %186 : vector<8x128xf32> to vector<8x128xbf16>
    %c0_64 = arith.constant 0 : index
    %c0_65 = arith.constant 0 : index
    %188 = vector.load %arg6[%c0_64, %c0_65] : memref<128x128xbf16, #tpu.memory_space<vmem>>, vector<128x128xbf16>
    %cst_66 = arith.constant dense<0.000000e+00> : vector<8x128xf32>
    %189 = tpu.matmul %187, %188, %cst_66 {dimension_numbers = #tpu.dot_dimension_numbers<[1], [0], [0], [1], [0, 0, 1, 1], [], []>} : vector<8x128xbf16>, vector<128x128xbf16>, vector<8x128xf32> -> vector<8x128xf32>
    %c0_67 = arith.constant 0 : index
    %c0_68 = arith.constant 0 : index
    %190 = vector.load %arg7[%c0_67, %c0_68] : memref<1x128xf32, #tpu.memory_space<vmem>>, vector<1x128xf32>
    %191 = vector.broadcast %190 : vector<1x128xf32> to vector<8x128xf32>
    %192 = arith.addf %189, %191 : vector<8x128xf32>
    %c0_69 = arith.constant 0 : index
    %c0_70 = arith.constant 0 : index
    %193 = vector.load %arg8[%c0_69, %c0_70] : memref<8x256xf32, #tpu.memory_space<vmem>>, vector<8x128xf32>
    tpu.vector_store %arg8[%c0_69, %c0_70], %186 {strides = array<i32>} : memref<8x256xf32, #tpu.memory_space<vmem>>, vector<8x128xf32>,
    %c0_71 = arith.constant 0 : index
    %c128 = arith.constant 128 : index
    %194 = vector.load %arg8[%c0_71, %c128] : memref<8x256xf32, #tpu.memory_space<vmem>>, vector<8x128xf32>
    tpu.vector_store %arg8[%c0_71, %c128], %192 {strides = array<i32>} : memref<8x256xf32, #tpu.memory_space<vmem>>, vector<8x128xf32>,
    return
  }
}

</mosaic_0001>

<bundles_post_ra>
// kernel: market_classifier_forward.1
= control target key start
LH: loop header
LB: loop body
LE: loop exit
PB: predicated region body
PF: predicated region fallthrough
CT: control target
= control target key end

     0   :  { %13 = vsyncpa [#allocation4], 0  ;;  %s1910_s0 = inlined_call_operand.vmem [shape: f32[64,8], index: 0, kind: input, shape index: {}]   ;;  %s1911_s1 = inlined_call_operand.hbm [shape: bf16[4,8,64], index: 1, kind: input, shape index: {}]   ;;  %s1912_s2 = inlined_call_operand.hbm [shape: f32[1,64], index: 2, kind: input, shape index: {}]   ;;  %s1913_s3 = inlined_call_operand.vmem [shape: bf16[64,256], index: 3, kind: input, shape index: {}]   ;;  %s1914_s4 = inlined_call_operand.hbm [shape: bf16[128,256], index: 4, kind: input, shape index: {}]   ;;  %s1915_s5 = inlined_call_operand.vmem [shape: f32[1,256], index: 5, kind: input, shape index: {}]   ;;  %s1916_s6 = inlined_call_operand.vmem [shape: bf16[128,128], index: 6, kind: input, shape index: {}]   ;;  %s1917_s7 = inlined_call_operand.vmem [shape: f32[1,128], index: 7, kind: input, shape index: {}]   ;;  %s1918_s8 = inlined_call_operand.vmem [shape: f32[8,256], index: 8, kind: output, shape index: {}]  }
   0x1   :  { %14 = vsyncpa [#allocation6], 0  ;;  %s1488_s27 = smov [#allocation5]   ;;  %s1489_s29 = smov [#allocation3]  }
   0x2   :  { %s35_s28 = sshll.u32 %s1488_s27, 4  ;;  %s22_s30 = sshll.u32 %s1489_s29, 4  ;;  %s36_s28 = int_to_ptr.vmem [resolvable:$true] %s35_s28  ;;  %s1543_s30 = int_to_ptr.vmem [resolvable:$true] %s22_s30 }
   0x3   :  { %s1418_s11 = scalar_lea.hbm %s1912_s2, 16 }
   0x4   :  { %p1419_p0 = scmp.ne.s32.totalorder %s1912_s2, %s1418_s11  ;;  %p1422_p1 = scmp.lt.u32.totalorder %s1418_s11, %s1912_s2 }
   0x6   :  { %p1424_p2 = pnand %p1422_p1, %p1419_p0 }
   0x8   :  { %1427 = shalt.err (!%p1424_p2)
}
   0x9   :  { %s1428_s16 = scalar_lea.vmem %s36_s28, 16  ;;  %s1432_s17 = scalar_lea.vmem %s36_s28, 32 }
   0xa   :  { %p1429_p3 = scmp.ne.s32.totalorder %s36_s28, %s1428_s16  ;;  %p1433_p4 = scmp.lt.s32.totalorder %s36_s28, %s36_s28 }
   0xb   :  { %p1434_p5 = scmp.lt.s32.totalorder %s1432_s17, %s1428_s16 }
   0xd   :  { %p1435_p6 = por %p1434_p5, %p1433_p4 }
   0xf   :  { %p1436_p7 = pnand %p1435_p6, %p1429_p3 }
  0x11   :  { %1439 = shalt.err (!%p1436_p7)
}
  0x12   :  { %38 = dma.hbm_to_vmem [thread:$0]  %s1912_s2, 16, %s36_s28, [#allocation6]  }
  0x13   :  { %s1440_s22 = scalar_lea.hbm %s1911_s1, 256 }
  0x14   :  { %p1441_p8 = scmp.ne.s32.totalorder %s1911_s1, %s1440_s22  ;;  %p1444_p9 = scmp.lt.u32.totalorder %s1440_s22, %s1911_s1 }
  0x16   :  { %p1446_p10 = pnand %p1444_p9, %p1441_p8 }
  0x18   :  { %1449 = shalt.err (!%p1446_p10)
}
  0x19   :  { %s1450_s27 = scalar_lea.vmem %s1543_s30, 256  ;;  %p1455_p12 = scmp.lt.s32.totalorder %s1543_s30, %s1543_s30 }
  0x1a   :  { %p1451_p11 = scmp.ne.s32.totalorder %s1543_s30, %s1450_s27  ;;  %p1456_p13 = scmp.lt.s32.totalorder %s1450_s27, %s1450_s27 }
  0x1c   :  { %p1457_p0 = por %p1456_p13, %p1455_p12 }
  0x1e   :  { %p1458_p1 = pnand %p1457_p0, %p1451_p11 }
  0x20   :  { %1461 = shalt.err (!%p1458_p1)
}
  0x21   :  { %s1490_s2 = smov 64   ;;  %s1491_s28 = smov 4  }
  0x22   :  { %28 = dma.hbm_to_vmem [thread:$0]  %s1911_s1, 256, %s1543_s30, [#allocation4], %s1490_s2, %s1490_s2, %s1491_s28  }
  0x23   :  { %s1492_s10 = smov [#allocation7]   ;;  %s1462_s14 = scalar_lea.hbm %s1914_s4, 2048 }
  0x24   :  { %s46_s11 = sshll.u32 %s1492_s10, 4  ;;  %p1463_p2 = scmp.ne.s32.totalorder %s1914_s4, %s1462_s14  ;;  %s47_s11 = int_to_ptr.vmem [resolvable:$true] %s46_s11 }
  0x25   :  { %p1466_p3 = scmp.lt.u32.totalorder %s1462_s14, %s1914_s4 }
  0x27   :  { %p1468_p4 = pnand %p1466_p3, %p1463_p2 }
  0x29   :  { %1471 = shalt.err (!%p1468_p4)
}
  0x2a   :  { %s1472_s19 = scalar_lea.vmem %s47_s11, 2048  ;;  %p1477_p6 = scmp.lt.s32.totalorder %s47_s11, %s47_s11 }
  0x2b   :  { %p1473_p5 = scmp.ne.s32.totalorder %s47_s11, %s1472_s19  ;;  %p1478_p7 = scmp.lt.s32.totalorder %s1472_s19, %s1472_s19 }
  0x2d   :  { %p1479_p8 = por %p1478_p7, %p1477_p6 }
  0x2f   :  { %p1480_p9 = pnand %p1479_p8, %p1473_p5 }
  0x31   :  { %1483 = shalt.err (!%p1480_p9)
}
  0x32   :  { %s1493_s1 = smov 128   ;;  %s1494_s30 = smov 8  }
  0x33   :  { %52 = dma.hbm_to_vmem [thread:$0]  %s1914_s4, 2048, %s47_s11, [#allocation6], %s1493_s1, %s1493_s1, %s1494_s30  }
  0x34   :  { %1484 = dma.done.wait [#allocation4], 256  }
  0x35   :  { %1485 = vsyncadd [#allocation4], 4294967040 }
  0x36   :  { %1486 = dma.done.wait [#allocation6], 2064  }
  0x37   :  { %1487 = vsyncadd [#allocation6], 4294965232  ;;  %v1495_v0 = vmov 0.0   ;;  %vm1496_vm0 = vmmov 0   ;;  %vm94_vm1 = vcmask 1043456   ;;  %v72_v2 = vld [vmem:[%s1910_s0 + $0x18] sm:$0xff] }
  0x38   :  { %1296 = vmatprep.subr.bf16.mxu1 %v1495_v0  ;;  %1226 = vmatprep.mubr.msk.bf16.mxu1 %vm1496_vm0, %v1495_v0  ;;  %v83_v1 = vld [vmem:[#allocation3 + $0x4] sm:$0xf]  ;;  %v77_v6 = vld [vmem:[#allocation3] sm:$0xf]  ;;  %vm84_vm2 = vcmask 64512   ;;  %v70_v7 = vld [vmem:[%s1910_s0 + $0x8] sm:$0xff] }
  0x39   :  { %1220 = vmatprep.subr.bf16.mxu0 %v1495_v0  ;;  %1222 = vmatprep.mubr.msk.bf16.mxu0 %vm1496_vm0, %v1495_v0  ;;  %v73_v3 = vld [vmem:[%s1910_s0 + $0x20] sm:$0xff]  ;;  %v96_v4 = vsel %vm94_vm1, %v83_v1, 0  ;;  %v71_v8 = vld [vmem:[%s1910_s0 + $0x10] sm:$0xff]  ;;  %v231_v9 = vld [vmem:[#allocation3 + $0x8] sm:$0xf]  ;;  %v164_v10 = vsel %vm94_vm1, %v77_v6, 0 }
  0x3a   :  { %v80_v5 = vpack.c.bf16 %v73_v3, %v72_v2  ;;  %1297 = vmatpush3.bf16.msra.mxu1 %v96_v4  ;;  %1221 = vmatpush3.bf16.msra.mxu0 %v96_v4  ;;  %v79_v11 = vpack.c.bf16 %v71_v8, %v70_v7  ;;  %v78_v12 = vld [vmem:[%s1910_s0 + $0x28] sm:$0xff]  ;;  %v242_v13 = vsel %vm94_vm1, %v231_v9, 0  ;;  %v227_v15 = vpack.c.bf16 %v72_v2, %v71_v8  ;;  %v69_v16 = vld [vmem:[%s1910_s0] sm:$0xff]  ;;  %v226_v21 = vld [vmem:[%s1910_s0 + $0x30] sm:$0xff] }
  0x3b   :  { %1234 = vmatprep.subr.bf16.mxu1 %v1495_v0  ;;  %1248 = vmatprep.subr.bf16.mxu0 %v1495_v0  ;;  %v81_v14 = vpack.c.bf16 %v78_v12, %v78_v12  ;;  %v314_v17 = vld [vmem:[#allocation3 + $0xc] sm:$0xf]  ;;  %v74_v18 = vpack.c.bf16 %v70_v7, %v69_v16  ;;  %v228_v19 = vpack.c.bf16 %v78_v12, %v73_v3  ;;  %v309_v25 = vld [vmem:[%s1910_s0 + $0x38] sm:$0xff]  ;;  %v1320_v33 = vld [vmem:[%s1913_s3] ss:$8 sps:$4 sm:$0xff]   ;;  %v1497_v51 = vmov 0  }
  0x3c   :  { %v325_v20 = vsel %vm94_vm1, %v314_v17, 0  ;;  %v229_v22 = vpack.c.bf16 %v226_v21, %v226_v21  ;;  %v76_v23 = vpack.c.bf16 %v73_v3, %v73_v3  ;;  %v311_v24 = vpack.c.bf16 %v226_v21, %v78_v12  ;;  %v1657_v27 = vld [vmem:[#allocation7 + $0x4] ss:$8 sps:$4 sm:$0xff]   ;;  %v1659_v28 = vld [vmem:[#allocation7] ss:$8 sps:$4 sm:$0xff]  }
  0x3d   :  { %1227 = vmatmul.mubr.msk.bf16.vlgmr.msra.gmra.mrb[0].mxu1 %vm84_vm2, %v80_v5  ;;  %1223 = vmatmul.mubr.msk.bf16.vlgmr.msra.gmra.mrb[0].mxu0 %vm84_vm2, %v79_v11  ;;  %v312_v26 = vpack.c.bf16 %v309_v25, %v309_v25  ;;  %v1663_v29 = vld [vmem:[#allocation7 + $0x14] ss:$8 sps:$4 sm:$0xff]   ;;  %v1665_v30 = vld [vmem:[#allocation7 + $0x10] ss:$8 sps:$4 sm:$0xff]   ;;  %v1669_v31 = vld [vmem:[#allocation7 + $0x24] ss:$8 sps:$4 sm:$0xff]  }
  0x3e   :  { %1235 = vmatpush3.bf16.msra.mxu1 %v164_v10  ;;  %1230 = vmatprep.mubr.msk.bf16.mxu1 %vm1496_vm0, %v1495_v0  ;;  %v1671_v32 = vld [vmem:[#allocation7 + $0x20] ss:$8 sps:$4 sm:$0xff]   ;;  %v1322_v34 = vld [vmem:[%s1913_s3 + $0x4] ss:$8 sps:$4 sm:$0xff]   ;;  %v1687_v37 = vld [vmem:[#allocation7 + $0x44] ss:$8 sps:$4 sm:$0xff]  }
  0x3f   :  { %1249 = vmatpush3.bf16.msra.mxu0 %v242_v13  ;;  %1262 = vmatprep.subr.bf16.mxu1 %v1495_v0  ;;  %v1681_v35 = vld [vmem:[#allocation7 + $0x34] ss:$8 sps:$4 sm:$0xff]   ;;  %v1683_v36 = vld [vmem:[#allocation7 + $0x30] ss:$8 sps:$4 sm:$0xff]   ;;  %v1331_v39 = vld [vmem:[%s1913_s3 + $0x14] ss:$8 sps:$4 sm:$0xff]  }
  0x40   :  { %1250 = vmatprep.mubr.msk.bf16.mxu0 %vm1496_vm0, %v1495_v0  ;;  %478 = vmatprep.subr.bf16.mxu0 %v1322_v34  ;;  %v1329_v38 = vld [vmem:[%s1913_s3 + $0x10] ss:$8 sps:$4 sm:$0xff]   ;;  %v1337_v41 = vld [vmem:[%s1913_s3 + $0x24] ss:$8 sps:$4 sm:$0xff]   ;;  %v1335_v43 = vld [vmem:[%s1913_s3 + $0x20] ss:$8 sps:$4 sm:$0xff]  }
  0x41   :  { %v1695_v40 = vld [vmem:[#allocation7 + $0x40] ss:$8 sps:$4 sm:$0xff]   ;;  %v1702_v42 = vld [vmem:[#allocation7 + $0x54] ss:$8 sps:$4 sm:$0xff]   ;;  %v1708_v44 = vld [vmem:[#allocation7 + $0x50] ss:$8 sps:$4 sm:$0xff]  }
  0x42   :  { %v1711_v45 = vld [vmem:[#allocation7 + $0x64] ss:$8 sps:$4 sm:$0xff]   ;;  %v1713_v46 = vld [vmem:[#allocation7 + $0x60] ss:$8 sps:$4 sm:$0xff]   ;;  %v1717_v47 = vld [vmem:[#allocation7 + $0x74] ss:$8 sps:$4 sm:$0xff]  }
  0x43   :  { %v1346_v48 = vld [vmem:[%s1913_s3 + $0x34] ss:$8 sps:$4 sm:$0xff]   ;;  %v1722_v49 = vld [vmem:[#allocation7 + $0x70] ss:$8 sps:$4 sm:$0xff]   ;;  %v1344_v50 = vld [vmem:[%s1913_s3 + $0x30] ss:$8 sps:$4 sm:$0xff]  }
  0x44   :  { %vm468_vm3 = vcmask 523264  }
  0x45   :  { %1231 = vmatmul.mubr.msk.bf16.gmra.mrb[4].mxu1 %vm84_vm2, %v81_v14  ;;  %1251 = vmatmul.mubr.msk.bf16.vlgmr.msra.gmra.mrb[4].mxu0 %vm84_vm2, %v227_v15 }
  0x46   :  { %1236 = vmatprep.mubr.msk.bf16.mxu1 %vm1496_vm0, %v1495_v0  ;;  %1254 = vmatprep.mubr.msk.bf16.mxu0 %vm1496_vm0, %v1495_v0 }
  0x47   :  { %479 = vmatpush1.bf16.msra.mxu0 %v1320_v33 }
  0x48   :  { %480 = vmatprep.subr.bf16.mxu0 %v1331_v39 }
  0x4b   :  { %481 = vmatpush1.bf16.msra.mxu0 %v1329_v38 }
  0x4c   :  { %482 = vmatprep.subr.bf16.mxu0 %v1337_v41 }
  0x4d   :  { %1237 = vmatmul.mubr.msk.bf16.vlgmr.msra.gmra.mrb[8].mxu1 %vm84_vm2, %v74_v18  ;;  %1255 = vmatmul.mubr.msk.bf16.gmra.mrb[8].mxu0 %vm84_vm2, %v228_v19 }
  0x4e   :  { %1263 = vmatpush3.bf16.msra.mxu1 %v325_v20  ;;  %1240 = vmatprep.mubr.msk.bf16.mxu1 %vm1496_vm0, %v1495_v0 }
  0x4f   :  { %1258 = vmatprep.mubr.msk.bf16.mxu0 %vm1496_vm0, %v1495_v0  ;;  %653 = vmatprep.subr.bf16.mxu1 %v1657_v27 }
  0x50   :  { %483 = vmatpush1.bf16.msra.mxu0 %v1335_v43 }
  0x51   :  { %484 = vmatprep.subr.bf16.mxu0 %v1346_v48 }
  0x54   :  { %485 = vmatpush1.bf16.msra.mxu0 %v1344_v50 }
  0x55   :  { %1241 = vmatmul.mubr.msk.bf16.gmra.mrb[12].mxu1 %vm84_vm2, %v227_v15  ;;  %1259 = vmatmul.mubr.msk.bf16.gmra.mrb[12].mxu0 %vm84_vm2, %v229_v22 }
  0x56   :  { %1244 = vmatprep.mubr.msk.bf16.mxu1 %vm1496_vm0, %v1495_v0  ;;  %510 = vmatprep.mubr.bf16.mxu0 %v1497_v51 }
  0x57   :  { %726 = vmatprep.subr.bf16.mxu0 %v1657_v27 }
  0x5d   :  { %1245 = vmatmul.mubr.msk.bf16.gmra.mrb[16].mxu1 %vm84_vm2, %v76_v23 }
  0x5e   :  { %1264 = vmatprep.mubr.msk.bf16.mxu1 %vm1496_vm0, %v1495_v0 }
  0x65   :  { %1265 = vmatmul.mubr.msk.bf16.vlgmr.msra.gmra.mrb[20].mxu1 %vm84_vm2, %v80_v5 }
  0x66   :  { %1268 = vmatprep.mubr.msk.bf16.mxu1 %vm1496_vm0, %v1495_v0  ;;  %654 = vmatpush1.bf16.msra.mxu1 %v1659_v28 }
  0x67   :  { %655 = vmatprep.subr.bf16.mxu1 %v1663_v29 }
  0x6a   :  { %656 = vmatpush1.bf16.msra.mxu1 %v1665_v30 }
  0x6b   :  { %657 = vmatprep.subr.bf16.mxu1 %v1669_v31 }
  0x6d   :  { %1269 = vmatmul.mubr.msk.bf16.gmra.mrb[24].mxu1 %vm84_vm2, %v311_v24 }
  0x6e   :  { %1272 = vmatprep.mubr.msk.bf16.mxu1 %vm1496_vm0, %v1495_v0  ;;  %658 = vmatpush1.bf16.msra.mxu1 %v1671_v32 }
  0x6f   :  { %659 = vmatprep.subr.bf16.mxu1 %v1681_v35 }
  0x72   :  { %660 = vmatpush1.bf16.msra.mxu1 %v1683_v36 }
  0x73   :  { %661 = vmatprep.subr.bf16.mxu1 %v1687_v37 }
  0x75   :  { %1273 = vmatmul.mubr.msk.bf16.gmra.mrb[28].mxu1 %vm84_vm2, %v312_v26 }
  0x76   :  { %662 = vmatpush1.bf16.msra.mxu1 %v1695_v40  ;;  %685 = vmatprep.mubr.bf16.mxu1 %v1497_v51 }
  0x77   :  { %663 = vmatprep.subr.bf16.mxu1 %v1702_v42 }
  0x7a   :  { %664 = vmatpush1.bf16.msra.mxu1 %v1708_v44 }
  0x7b   :  { %665 = vmatprep.subr.bf16.mxu1 %v1711_v45 }
  0x7e   :  { %666 = vmatpush1.bf16.msra.mxu1 %v1713_v46 }
  0x7f   :  { %667 = vmatprep.subr.bf16.mxu1 %v1717_v47 }
  0x82   :  { %668 = vmatpush1.bf16.msra.mxu1 %v1722_v49 }
  0x83   :  { %799 = vmatprep.subr.bf16.mxu1 %v1657_v27 }
  0x85   :  { %686 = vmatmul.mubr.bf16.vlgmr.msra.gmra.mrb[32].mxu1 %v1497_v51 }
  0x86   :  { %800 = vmatpush1.bf16.msra.mxu1 %v1659_v28  ;;  %831 = vmatprep.mubr.bf16.mxu1 %v1497_v51 }
  0x87   :  { %801 = vmatprep.subr.bf16.mxu1 %v1663_v29 }
  0x8a   :  { %802 = vmatpush1.bf16.msra.mxu1 %v1665_v30 }
  0x8b   :  { %803 = vmatprep.subr.bf16.mxu1 %v1669_v31 }
  0x8e   :  { %804 = vmatpush1.bf16.msra.mxu1 %v1671_v32 }
  0x8f   :  { %805 = vmatprep.subr.bf16.mxu1 %v1681_v35 }
  0x92   :  { %806 = vmatpush1.bf16.msra.mxu1 %v1683_v36 }
  0x93   :  { %807 = vmatprep.subr.bf16.mxu1 %v1687_v37 }
  0x96   :  { %808 = vmatpush1.bf16.msra.mxu1 %v1695_v40 }
  0x97   :  { %809 = vmatprep.subr.bf16.mxu1 %v1702_v42 }
  0x9a   :  { %810 = vmatpush1.bf16.msra.mxu1 %v1708_v44 }
  0x9b   :  { %811 = vmatprep.subr.bf16.mxu1 %v1711_v45 }
  0x9e   :  { %812 = vmatpush1.bf16.msra.mxu1 %v1713_v46 }
  0x9f   :  { %813 = vmatprep.subr.bf16.mxu1 %v1717_v47 }
  0xa2   :  { %814 = vmatpush1.bf16.msra.mxu1 %v1722_v49 }
  0xa3   :  { %1276 = vmatprep.subr.bf16.mxu1 %v1495_v0 }
 0x110   :  { %v140_v52 = vpop.f32.mrb[0].mxu1  ;;  %v132_v53 = vpop.f32.mrb[0].mxu0 }
 0x111   :  { %v1228_v54 = vpop.f32.mrb[1].mxu1  ;;  %v1224_v55 = vpop.f32.mrb[1].mxu0 }
 0x112   :  { %v143_v56 = vpop.f32.mrb[2].mxu1  ;;  %v135_v57 = vpop.f32.mrb[2].mxu0  ;;  %v1148_v54 = vld [vmem:[#allocation5] ss:$0 sm:$0xff] }
 0x113   :  { %v1229_v58 = vpop.f32.mrb[3].mxu1  ;;  %v1225_v59 = vpop.f32.mrb[3].mxu0 }
 0x118   :  { %v148_v60 = vpop.f32.mrb[4].mxu1  ;;  %v278_v61 = vpop.f32.mrb[4].mxu0 }
 0x119   :  { %v1232_v62 = vpop.f32.mrb[5].mxu1  ;;  %v1252_v63 = vpop.f32.mrb[5].mxu0 }
 0x11a   :  { %v151_v1 = vpop.f32.mrb[6].mxu1  ;;  %v281_v2 = vpop.f32.mrb[6].mxu0 }
 0x11b   :  { %v1233_v3 = vpop.f32.mrb[7].mxu1  ;;  %v1253_v4 = vpop.f32.mrb[7].mxu0 }
 0x120   :  { %v200_v5 = vpop.f32.mrb[8].mxu1  ;;  %v286_v6 = vpop.f32.mrb[8].mxu0 }
 0x121   :  { %v201_v7 = vadd.f32 %v200_v5, %v132_v53  ;;  %v1238_v8 = vpop.f32.mrb[9].mxu1  ;;  %v1256_v9 = vpop.f32.mrb[9].mxu0 }
 0x122   :  { %v203_v10 = vpop.f32.mrb[10].mxu1  ;;  %v289_v11 = vpop.f32.mrb[10].mxu0 }
 0x123   :  { %v204_v12 = vadd.f32 %v203_v10, %v135_v57  ;;  %v300_v13 = vadd.f32 %v278_v61, %v201_v7  ;;  %v1239_v14 = vpop.f32.mrb[11].mxu1  ;;  %v1257_v15 = vpop.f32.mrb[11].mxu0 }
 0x125   :  { %v301_v16 = vadd.f32 %v281_v2, %v204_v12 }
 0x128   :  { %v208_v17 = vpop.f32.mrb[12].mxu1  ;;  %v294_v18 = vpop.f32.mrb[12].mxu0 }
 0x129   :  { %v209_v19 = vadd.f32 %v208_v17, %v140_v52  ;;  %v1242_v20 = vpop.f32.mrb[13].mxu1  ;;  %v1260_v21 = vpop.f32.mrb[13].mxu0 }
 0x12a   :  { %v211_v22 = vpop.f32.mrb[14].mxu1  ;;  %v297_v23 = vpop.f32.mrb[14].mxu0 }
 0x12b   :  { %v212_v24 = vadd.f32 %v211_v22, %v143_v56  ;;  %v302_v25 = vadd.f32 %v286_v6, %v209_v19  ;;  %v1243_v26 = vpop.f32.mrb[15].mxu1  ;;  %v1261_v33 = vpop.f32.mrb[15].mxu0 }
 0x12c   :  { %v416_v33 = vld [vmem:[%s1915_s5] sm:$0x3] }
 0x12d   :  { %v303_v34 = vadd.f32 %v289_v11, %v212_v24  ;;  %v418_v24 = vlaneseq }
 0x130   :  { %v216_v38 = vpop.f32.mrb[16].mxu1 }
 0x131   :  { %v217_v39 = vadd.f32 %v216_v38, %v148_v60  ;;  %v1246_v41 = vpop.f32.mrb[17].mxu1 }
 0x132   :  { %v219_v43 = vpop.f32.mrb[18].mxu1 }
 0x133   :  { %v304_v48 = vadd.f32 %v294_v18, %v217_v39  ;;  %v1247_v50 = vpop.f32.mrb[19].mxu1 }
 0x138   :  { %v361_v53 = vpop.f32.mrb[20].mxu1 }
 0x139   :  { %v383_v55 = vadd.f32 %v361_v53, %v300_v13  ;;  %v1266_v57 = vpop.f32.mrb[21].mxu1 }
 0x13a   :  { %v364_v52 = vpop.f32.mrb[22].mxu1 }
 0x13b   :  { %v395_v58 = vadd.f32 %v1148_v54, %v383_v55  ;;  %v384_v59 = vadd.f32 %v364_v52, %v301_v16  ;;  %v1267_v61 = vpop.f32.mrb[23].mxu1 }
 0x13d   :  { %v396_v62 = vadd.f32 %v1148_v54, %v384_v59  ;;  %v400_v56 = vmax.f32 %v395_v58, 0.0 }
 0x13f   :  { %v401_v63 = vmax.f32 %v396_v62, 0.0 }
 0x140   :  { %v369_v1 = vpop.f32.mrb[24].mxu1 }
 0x141   :  { %v405_v2 = vpack.c.bf16 %v401_v63, %v400_v56  ;;  %v385_v3 = vadd.f32 %v369_v1, %v302_v25  ;;  %v1270_v60 = vpop.f32.mrb[25].mxu1  ;;  %v419_v25 = vshrl.u32 %v418_v24, 7  ;;  %v1790_v1 = vand.u32 127, %v418_v24 }
 0x142   :  { %v372_v4 = vpop.f32.mrb[26].mxu1 }
 0x143   :  { %v397_v5 = vadd.f32 %v1148_v54, %v385_v3  ;;  %v386_v6 = vadd.f32 %v372_v4, %v303_v34  ;;  %1157 = vmatmul.mubr.msk.bf16.vlgmr.msra.gmra.mrb[16].mxu0 %vm468_vm3, %v405_v2  ;;  %v1271_v7 = vpop.f32.mrb[27].mxu1  ;;  %v420_v26 = vsub.s32 0, %v419_v25  ;;  %v424_v34 = vsub.s32 1, %v419_v25 }
 0x144   :  { %520 = vmatprep.mubr.bf16.mxu0 %v1497_v51  ;;  %727 = vmatpush1.bf16.msra.mxu0 %v1659_v28  ;;  %vm567_vm4 = vcmp.lt.s32.totalorder %v1790_v1, 64 }
 0x145   :  { %v398_v8 = vadd.f32 %v1148_v54, %v386_v6  ;;  %728 = vmatprep.subr.bf16.mxu0 %v1663_v29  ;;  %v402_v9 = vmax.f32 %v397_v5, 0.0  ;;  %v1776_v38 = vrot.slane %v416_v33, %v420_v26  ;;  %v1778_v39 = vrot.slane %v416_v33, %v424_v34 }
 0x147   :  { %v403_v10 = vmax.f32 %v398_v8, 0.0 }
 0x148   :  { %v377_v11 = vpop.f32.mrb[28].mxu1  ;;  %729 = vmatpush1.bf16.msra.mxu0 %v1665_v30 }
 0x149   :  { %v406_v12 = vpack.c.bf16 %v403_v10, %v402_v9  ;;  %v387_v13 = vadd.f32 %v377_v11, %v304_v48  ;;  %v1274_v14 = vpop.f32.mrb[29].mxu1  ;;  %730 = vmatprep.subr.bf16.mxu0 %v1669_v31 }
 0x14a   :  { %v380_v15 = vpop.f32.mrb[30].mxu1 }
 0x14b   :  { %v399_v16 = vadd.f32 %v1148_v54, %v387_v13  ;;  %1158 = vmatmul.mubr.msk.bf16.gmra.mrb[20].mxu0 %vm468_vm3, %v406_v12  ;;  %v1275_v17 = vpop.f32.mrb[31].mxu1 }
 0x14c   :  { %530 = vmatprep.mubr.bf16.mxu0 %v1497_v51  ;;  %731 = vmatpush1.bf16.msra.mxu0 %v1671_v32 }
 0x14d   :  { %v404_v18 = vmax.f32 %v399_v16, 0.0  ;;  %732 = vmatprep.subr.bf16.mxu0 %v1681_v35 }
 0x14f   :  { %v407_v19 = vpack.c.bf16 %v404_v18, %v404_v18 }
 0x150   :  { %733 = vmatpush1.bf16.msra.mxu0 %v1683_v36 }
 0x151   :  { %734 = vmatprep.subr.bf16.mxu0 %v1687_v37 }
 0x153   :  { %1159 = vmatmul.mubr.msk.bf16.gmra.mrb[24].mxu0 %vm468_vm3, %v407_v19 }
 0x154   :  { %735 = vmatpush1.bf16.msra.mxu0 %v1695_v40  ;;  %758 = vmatprep.mubr.bf16.mxu0 %v1497_v51 }
 0x155   :  { %736 = vmatprep.subr.bf16.mxu0 %v1702_v42 }
 0x158   :  { %737 = vmatpush1.bf16.msra.mxu0 %v1708_v44  ;;  %v687_v20 = vpop.f32.mrb[32].mxu1 }
 0x159   :  { %738 = vmatprep.subr.bf16.mxu0 %v1711_v45  ;;  %v689_v21 = vpop.f32.mrb[33].mxu1 }
 0x15a   :  { %v691_v22 = vpop.f32.mrb[34].mxu1 }
 0x15b   :  { %v692_v23 = vpop.f32.mrb[35].mxu1 }
 0x15c   :  { %739 = vmatpush1.bf16.msra.mxu0 %v1713_v46 }
 0x15d   :  { %740 = vmatprep.subr.bf16.mxu0 %v1717_v47 }
 0x160   :  { %741 = vmatpush1.bf16.msra.mxu0 %v1722_v49 }
 0x161   :  { %872 = vmatprep.subr.bf16.mxu0 %v1657_v27 }
 0x216   :  { %v512_v41 = vpop.f32.mrb[16].mxu0 }
 0x217   :  { %v513_v43 = vadd.f32 %v512_v41, %v1776_v38  ;;  %v514_v48 = vpop.f32.mrb[17].mxu0 }
 0x218   :  { %v515_v50 = vadd.f32 %v514_v48, %v1778_v39  ;;  %v516_v53 = vpop.f32.mrb[18].mxu0 }
 0x219   :  { %v694_v54 = vadd.f32 %v687_v20, %v513_v43  ;;  %v518_v55 = vpop.f32.mrb[19].mxu0  ;;  %v517_v17 = vadd.f32 %v516_v53, %v1776_v38 }
 0x21a   :  { %v695_v57 = vadd.f32 %v689_v21, %v515_v50  ;;  %v519_v18 = vadd.f32 %v518_v55, %v1778_v39 }
 0x21b   :  { %v1176_v4 = vmul.f32 -1.442695, %v694_v54 }
 0x21c   :  { %v1177_v52 = vmul.f32 -1.442695, %v695_v57 }
 0x21e   :  { %1358 = vpow2.f32 %v1177_v52  ;;  %v1782_v58 = vpop.f32.mrb[20].mxu0 }
 0x21f   :  { %v1784_v59 = vpop.f32.mrb[21].mxu0  ;;  %1360 = vtanh.f32 %v695_v57 }
 0x220   :  { %v1786_v61 = vpop.f32.mrb[22].mxu0 }
 0x221   :  { %v1788_v62 = vpop.f32.mrb[23].mxu0 }
 0x228   :  { %v1359_v56 = vpop.eup %1358 }
 0x229   :  { %v706_v63 = vadd.f32 1.0, %v1359_v56  ;;  %v1361_v2 = vpop.eup %1360 }
 0x22b   :  { %1362 = vrcp.f32 %v706_v63 }
 0x22c   :  { %1364 = vpow2.f32 %v1176_v4  ;;  %v523_v4 = vadd.f32 %v1782_v58, %v1776_v38 }
 0x235   :  { %v1363_v3 = vpop.eup %1362 }
 0x236   :  { %v709_v60 = vsel %vm567_vm4, %v1361_v2, %v1363_v3  ;;  %v1365_v5 = vpop.eup %1364 }
 0x237   :  { %710 = vrot.lane.b32.xlu0 %v709_v60, %s1490_s2  ;;  %v699_v6 = vadd.f32 1.0, %v1365_v5  ;;  %v525_v5 = vadd.f32 %v1784_v59, %v1778_v39 }
 0x239   :  { %1366 = vrcp.f32 %v699_v6 }
 0x243   :  { %v1367_v7 = vpop.eup %1366 }
 0x244   :  { %v713_v9 = vmul.f32 0.0, %v1367_v7 }
 0x2a9   :  { %v711_v8 = vpop.permute.xlu0 %710 }
 0x2aa   :  { %v712_v10 = vmul.f32 %v711_v8, %v709_v60 }
 0x2ac   :  { %v714_v11 = vadd.f32 %v713_v9, %v712_v10 }
 0x2ae   :  { %1368 = vtanh.f32 %v714_v11 }
 0x2b8   :  { %v1369_v12 = vpop.eup %1368 }
 0x2b9   :  { %716 = vrot.lane.b32.xlu0 %v1369_v12, %s1490_s2 }
 0x32b   :  { %v717_v13 = vpop.permute.xlu0 %716 }
 0x32c   :  { %v718_v14 = vmul.f32 %v1367_v7, %v717_v13 }
 0x32e   :  { %v719_v15 = vsel %vm567_vm4, %v718_v14, %v714_v11 }
 0x32f   :  { %v725_v16 = vpack.c.bf16 %v719_v15, %v719_v15 }
 0x331   :  { %759 = vmatmul.mubr.bf16.vlgmr.msra.gmra.mrb[28].mxu0 %v725_v16 }
 0x332   :  { %873 = vmatpush1.bf16.msra.mxu0 %v1659_v28  ;;  %904 = vmatprep.mubr.bf16.mxu0 %v1497_v51 }
 0x333   :  { %874 = vmatprep.subr.bf16.mxu0 %v1663_v29 }
 0x336   :  { %875 = vmatpush1.bf16.msra.mxu0 %v1665_v30 }
 0x337   :  { %876 = vmatprep.subr.bf16.mxu0 %v1669_v31 }
 0x33a   :  { %877 = vmatpush1.bf16.msra.mxu0 %v1671_v32 }
 0x33b   :  { %878 = vmatprep.subr.bf16.mxu0 %v1681_v35 }
 0x33e   :  { %879 = vmatpush1.bf16.msra.mxu0 %v1683_v36 }
 0x33f   :  { %880 = vmatprep.subr.bf16.mxu0 %v1687_v37 }
 0x342   :  { %881 = vmatpush1.bf16.msra.mxu0 %v1695_v40 }
 0x343   :  { %882 = vmatprep.subr.bf16.mxu0 %v1702_v42 }
 0x346   :  { %883 = vmatpush1.bf16.msra.mxu0 %v1708_v44 }
 0x347   :  { %884 = vmatprep.subr.bf16.mxu0 %v1711_v45 }
 0x34a   :  { %885 = vmatpush1.bf16.msra.mxu0 %v1713_v46 }
 0x34b   :  { %886 = vmatprep.subr.bf16.mxu0 %v1717_v47 }
 0x34e   :  { %887 = vmatpush1.bf16.msra.mxu0 %v1722_v49 }
 0x34f   :  { %945 = vmatprep.subr.bf16.mxu0 %v1657_v27 }
 0x404   :  { %v760_v19 = vpop.f32.mrb[28].mxu0 }
 0x405   :  { %v767_v20 = vadd.f32 %v760_v19, %v517_v17  ;;  %v762_v21 = vpop.f32.mrb[29].mxu0 }
 0x406   :  { %v768_v22 = vadd.f32 %v762_v21, %v519_v18  ;;  %v764_v23 = vpop.f32.mrb[30].mxu0 }
 0x407   :  { %v765_v24 = vpop.f32.mrb[31].mxu0  ;;  %v1178_v43 = vmul.f32 -1.442695, %v767_v20 }
 0x408   :  { %v1179_v25 = vmul.f32 -1.442695, %v768_v22 }
 0x40a   :  { %1370 = vpow2.f32 %v1179_v25 }
 0x40b   :  { %1372 = vtanh.f32 %v768_v22 }
 0x414   :  { %v1371_v26 = vpop.eup %1370 }
 0x415   :  { %v779_v33 = vadd.f32 1.0, %v1371_v26  ;;  %v1373_v34 = vpop.eup %1372 }
 0x417   :  { %1374 = vrcp.f32 %v779_v33 }
 0x418   :  { %1376 = vpow2.f32 %v1178_v43 }
 0x421   :  { %v1375_v41 = vpop.eup %1374 }
 0x422   :  { %v782_v27 = vsel %vm567_vm4, %v1373_v34, %v1375_v41  ;;  %v1377_v48 = vpop.eup %1376 }
 0x423   :  { %783 = vrot.lane.b32.xlu1 %v782_v27, %s1490_s2  ;;  %v772_v50 = vadd.f32 1.0, %v1377_v48 }
 0x425   :  { %1378 = vrcp.f32 %v772_v50 }
 0x42f   :  { %v1379_v53 = vpop.eup %1378 }
 0x430   :  { %v786_v55 = vmul.f32 %v1379_v53, %v719_v15 }
 0x495   :  { %v784_v54 = vpop.permute.xlu1 %783 }
 0x496   :  { %v785_v57 = vmul.f32 %v784_v54, %v782_v27 }
 0x498   :  { %v787_v52 = vadd.f32 %v786_v55, %v785_v57 }
 0x49a   :  { %1380 = vtanh.f32 %v787_v52 }
 0x4a4   :  { %v1381_v56 = vpop.eup %1380 }
 0x4a5   :  { %789 = vrot.lane.b32.xlu1 %v1381_v56, %s1490_s2 }
 0x517   :  { %v790_v63 = vpop.permute.xlu1 %789 }
 0x518   :  { %v791_v2 = vmul.f32 %v1379_v53, %v790_v63 }
 0x51a   :  { %v792_v3 = vsel %vm567_vm4, %v791_v2, %v787_v52 }
 0x51b   :  { %v798_v60 = vpack.c.bf16 %v792_v3, %v792_v3 }
 0x51d   :  { %832 = vmatmul.mubr.bf16.vlgmr.msra.gmra.mrb[36].mxu1 %v798_v60 }
 0x51e   :  { %1292 = vmatprep.mubr.msk.bf16.mxu1 %vm1496_vm0, %v1495_v0 }
 0x5f0   :  { %v833_v6 = vpop.f32.mrb[36].mxu1 }
 0x5f1   :  { %v840_v7 = vadd.f32 %v833_v6, %v523_v4  ;;  %v835_v8 = vpop.f32.mrb[37].mxu1 }
 0x5f2   :  { %v841_v9 = vadd.f32 %v835_v8, %v525_v5  ;;  %v837_v10 = vpop.f32.mrb[38].mxu1 }
 0x5f3   :  { %v838_v11 = vpop.f32.mrb[39].mxu1  ;;  %v1180_v59 = vmul.f32 -1.442695, %v840_v7  ;;  %v1352_v10 = vld [vmem:[%s1916_s6 + $0x10] sm:$0xff]  }
 0x5f4   :  { %v1181_v12 = vmul.f32 -1.442695, %v841_v9  ;;  %v1353_v11 = vld [vmem:[%s1916_s6 + $0x18] sm:$0xff]  }
 0x5f6   :  { %1382 = vpow2.f32 %v1181_v12  ;;  %v1354_v12 = vld [vmem:[%s1916_s6 + $0x20] sm:$0xff]  }
 0x5f7   :  { %1384 = vtanh.f32 %v841_v9  ;;  %v1350_v9 = vld [vmem:[%s1916_s6] sm:$0xff]  }
 0x5f8   :  { %1277 = vmatpush3.bf16.msra.mxu1 %v1350_v9 }
 0x5f9   :  { %1278 = vmatprep.subr.bf16.mxu1 %v1495_v0 }
 0x600   :  { %v1383_v13 = vpop.eup %1382 }
 0x601   :  { %v852_v14 = vadd.f32 1.0, %v1383_v13  ;;  %v1385_v15 = vpop.eup %1384  ;;  %v1355_v13 = vld [vmem:[%s1916_s6 + $0x28] sm:$0xff]  }
 0x603   :  { %1386 = vrcp.f32 %v852_v14  ;;  %v1356_v14 = vld [vmem:[%s1916_s6 + $0x30] sm:$0xff]  }
 0x604   :  { %1388 = vpow2.f32 %v1180_v59 }
 0x60d   :  { %v1387_v16 = vpop.eup %1386 }
 0x60e   :  { %v855_v58 = vsel %vm567_vm4, %v1385_v15, %v1387_v16  ;;  %v1389_v17 = vpop.eup %1388 }
 0x60f   :  { %856 = vrot.lane.b32.xlu0 %v855_v58, %s1490_s2  ;;  %v845_v18 = vadd.f32 1.0, %v1389_v17 }
 0x611   :  { %1390 = vrcp.f32 %v845_v18 }
 0x61b   :  { %v1391_v19 = vpop.eup %1390 }
 0x61c   :  { %v859_v21 = vmul.f32 %v1391_v19, %v792_v3 }
 0x681   :  { %v857_v20 = vpop.permute.xlu0 %856 }
 0x682   :  { %v858_v22 = vmul.f32 %v857_v20, %v855_v58 }
 0x684   :  { %v860_v23 = vadd.f32 %v859_v21, %v858_v22  ;;  %v1357_v22 = vld [vmem:[%s1916_s6 + $0x38] sm:$0xff]  }
 0x686   :  { %1392 = vtanh.f32 %v860_v23 }
 0x690   :  { %v1393_v24 = vpop.eup %1392 }
 0x691   :  { %862 = vrot.lane.b32.xlu1 %v1393_v24, %s1490_s2 }
 0x703   :  { %v863_v25 = vpop.permute.xlu1 %862 }
 0x704   :  { %v864_v26 = vmul.f32 %v1391_v19, %v863_v25 }
 0x706   :  { %v865_v33 = vsel %vm567_vm4, %v864_v26, %v860_v23  ;;  %v1186_v26 = vld [vmem:[%s1917_s7] ss:$0 sm:$0xff] }
 0x707   :  { %v871_v34 = vpack.c.bf16 %v865_v33, %v865_v33 }
 0x709   :  { %905 = vmatmul.mubr.bf16.vlgmr.msra.gmra.mrb[32].mxu0 %v871_v34 }
 0x70a   :  { %946 = vmatpush1.bf16.msra.mxu0 %v1659_v28  ;;  %977 = vmatprep.mubr.bf16.mxu0 %v1497_v51  ;;  %v527_v28 = vadd.f32 %v1786_v61, %v1776_v38 }
 0x70b   :  { %947 = vmatprep.subr.bf16.mxu0 %v1663_v29  ;;  %v529_v29 = vadd.f32 %v1788_v62, %v1778_v39 }
 0x70e   :  { %948 = vmatpush1.bf16.msra.mxu0 %v1665_v30 }
 0x70f   :  { %949 = vmatprep.subr.bf16.mxu0 %v1669_v31 }
 0x712   :  { %950 = vmatpush1.bf16.msra.mxu0 %v1671_v32 }
 0x713   :  { %951 = vmatprep.subr.bf16.mxu0 %v1681_v35 }
 0x716   :  { %952 = vmatpush1.bf16.msra.mxu0 %v1683_v36 }
 0x717   :  { %953 = vmatprep.subr.bf16.mxu0 %v1687_v37 }
 0x71a   :  { %954 = vmatpush1.bf16.msra.mxu0 %v1695_v40 }
 0x71b   :  { %955 = vmatprep.subr.bf16.mxu0 %v1702_v42 }
 0x71e   :  { %956 = vmatpush1.bf16.msra.mxu0 %v1708_v44 }
 0x71f   :  { %957 = vmatprep.subr.bf16.mxu0 %v1711_v45 }
 0x722   :  { %958 = vmatpush1.bf16.msra.mxu0 %v1713_v46 }
 0x723   :  { %959 = vmatprep.subr.bf16.mxu0 %v1717_v47 }
 0x726   :  { %960 = vmatpush1.bf16.msra.mxu0 %v1722_v49 }
 0x7dc   :  { %v906_v30 = vpop.f32.mrb[32].mxu0 }
 0x7dd   :  { %v913_v31 = vadd.f32 %v906_v30, %v527_v28  ;;  %v908_v32 = vpop.f32.mrb[33].mxu0 }
 0x7de   :  { %v914_v35 = vadd.f32 %v908_v32, %v529_v29  ;;  %v910_v36 = vpop.f32.mrb[34].mxu0 }
 0x7df   :  { %v911_v37 = vpop.f32.mrb[35].mxu0  ;;  %v1182_v49 = vmul.f32 -1.442695, %v913_v31 }
 0x7e0   :  { %v1183_v40 = vmul.f32 -1.442695, %v914_v35 }
 0x7e2   :  { %1394 = vpow2.f32 %v1183_v40 }
 0x7e3   :  { %1396 = vtanh.f32 %v914_v35 }
 0x7ec   :  { %v1395_v42 = vpop.eup %1394 }
 0x7ed   :  { %v925_v44 = vadd.f32 1.0, %v1395_v42  ;;  %v1397_v45 = vpop.eup %1396 }
 0x7ef   :  { %1398 = vrcp.f32 %v925_v44 }
 0x7f0   :  { %1400 = vpow2.f32 %v1182_v49 }
 0x7f9   :  { %v1399_v46 = vpop.eup %1398 }
 0x7fa   :  { %v928_v47 = vsel %vm567_vm4, %v1397_v45, %v1399_v46  ;;  %v1401_v51 = vpop.eup %1400 }
 0x7fb   :  { %929 = vrot.lane.b32.xlu0 %v928_v47, %s1490_s2  ;;  %v918_v61 = vadd.f32 1.0, %v1401_v51 }
 0x7fd   :  { %1402 = vrcp.f32 %v918_v61 }
 0x807   :  { %v1403_v62 = vpop.eup %1402 }
 0x808   :  { %v932_v27 = vmul.f32 %v1403_v62, %v865_v33 }
 0x86d   :  { %v930_v41 = vpop.permute.xlu0 %929 }
 0x86e   :  { %v931_v43 = vmul.f32 %v930_v41, %v928_v47 }
 0x870   :  { %v933_v48 = vadd.f32 %v932_v27, %v931_v43 }
 0x872   :  { %1404 = vtanh.f32 %v933_v48 }
 0x87c   :  { %v1405_v50 = vpop.eup %1404 }
 0x87d   :  { %935 = vrot.lane.b32.xlu1 %v1405_v50, %s1490_s2 }
 0x8ef   :  { %v936_v53 = vpop.permute.xlu1 %935 }
 0x8f0   :  { %v937_v54 = vmul.f32 %v1403_v62, %v936_v53 }
 0x8f2   :  { %v938_v55 = vsel %vm567_vm4, %v937_v54, %v933_v48 }
 0x8f3   :  { %v944_v57 = vpack.c.bf16 %v938_v55, %v938_v55 }
 0x8f5   :  { %978 = vmatmul.mubr.bf16.vlgmr.msra.gmra.mrb[24].mxu0 %v944_v57 }
 0x9c8   :  { %v979_v52 = vpop.f32.mrb[24].mxu0 }
 0x9c9   :  { %v981_v56 = vpop.f32.mrb[25].mxu0  ;;  %v1298_v15 = vadd.f32 %v979_v52, %v1776_v38 }
 0x9ca   :  { %v1299_v63 = vadd.f32 %v981_v56, %v1778_v39  ;;  %v983_v2 = vpop.f32.mrb[26].mxu0  ;;  %v1351_v39 = vld [vmem:[%s1916_s6 + $0x8] sm:$0xff]  }
 0x9cb   :  { %v984_v3 = vpop.f32.mrb[27].mxu0  ;;  %1279 = vmatpush3.bf16.msra.mxu1 %v1351_v39  ;;  %v1184_v16 = vmul.f32 -1.442695, %v1298_v15 }
 0x9cc   :  { %v1185_v60 = vmul.f32 -1.442695, %v1299_v63  ;;  %1280 = vmatprep.subr.bf16.mxu1 %v1495_v0 }
 0x9ce   :  { %1406 = vpow2.f32 %v1185_v60 }
 0x9cf   :  { %1408 = vtanh.f32 %v1299_v63  ;;  %1281 = vmatpush3.bf16.msra.mxu1 %v1352_v10 }
 0x9d0   :  { %1282 = vmatprep.subr.bf16.mxu1 %v1495_v0 }
 0x9d3   :  { %1283 = vmatpush3.bf16.msra.mxu1 %v1353_v11 }
 0x9d4   :  { %1284 = vmatprep.subr.bf16.mxu1 %v1495_v0 }
 0x9d7   :  { %1285 = vmatpush3.bf16.msra.mxu1 %v1354_v12 }
 0x9d8   :  { %v1407_v4 = vpop.eup %1406  ;;  %1286 = vmatprep.subr.bf16.mxu1 %v1495_v0 }
 0x9d9   :  { %v998_v5 = vadd.f32 1.0, %v1407_v4  ;;  %v1409_v6 = vpop.eup %1408 }
 0x9db   :  { %1410 = vrcp.f32 %v998_v5  ;;  %1287 = vmatpush3.bf16.msra.mxu1 %v1355_v13 }
 0x9dc   :  { %1288 = vmatprep.subr.bf16.mxu1 %v1495_v0  ;;  %1412 = vpow2.f32 %v1184_v16 }
 0x9df   :  { %1289 = vmatpush3.bf16.msra.mxu1 %v1356_v14 }
 0x9e0   :  { %1290 = vmatprep.subr.bf16.mxu1 %v1495_v0 }
 0x9e3   :  { %1291 = vmatpush3.bf16.msra.mxu1 %v1357_v22 }
 0x9e5   :  { %v1411_v7 = vpop.eup %1410 }
 0x9e6   :  { %v1001_v8 = vsel %vm567_vm4, %v1409_v6, %v1411_v7  ;;  %v1413_v58 = vpop.eup %1412 }
 0x9e7   :  { %1002 = vrot.lane.b32.xlu0 %v1001_v8, %s1490_s2  ;;  %v991_v59 = vadd.f32 1.0, %v1413_v58 }
 0x9e9   :  { %1414 = vrcp.f32 %v991_v59 }
 0x9f3   :  { %v1415_v17 = vpop.eup %1414 }
 0x9f4   :  { %v1005_v19 = vmul.f32 %v1415_v17, %v938_v55 }
 0xa59   :  { %v1003_v18 = vpop.permute.xlu0 %1002 }
 0xa5a   :  { %v1004_v20 = vmul.f32 %v1003_v18, %v1001_v8 }
 0xa5c   :  { %v1006_v21 = vadd.f32 %v1005_v19, %v1004_v20 }
 0xa5e   :  { %1416 = vtanh.f32 %v1006_v21 }
 0xa68   :  { %v1417_v23 = vpop.eup %1416 }
 0xa69   :  { %1008 = vrot.lane.b32.xlu1 %v1417_v23, %s1490_s2 }
 0xadb   :  { %v1009_v0 = vpop.permute.xlu1 %1008 }
 0xadc   :  { %v1010_v38 = vmul.f32 %v1415_v17, %v1009_v0 }
 0xade   :  { %v1011_v24 = vsel %vm567_vm4, %v1010_v38, %v1006_v21 }
 0xadf   :  { %v1012_v25 = vpack.c.bf16 %v1011_v24, %v1011_v24  ;;  %1124 = vst [vmem:[%s1918_s8] sm:$0xff] %v1011_v24 }
 0xae1   :  { %1293 = vmatmul.mubr.bf16.vlgmr.msra.gmra.mrb[40].mxu1 %v1012_v25 }
 0xbb4   :  { %v1118_v33 = vpop.f32.mrb[40].mxu1 }
 0xbb5   :  { %v1119_v34 = vadd.f32 %v1186_v26, %v1118_v33  ;;  %v1294_v28 = vpop.f32.mrb[41].mxu1 }
 0xbb6   :  { %v1121_v29 = vpop.f32.mrb[42].mxu1 }
 0xbb7   :  { %1125 = vst [vmem:[%s1918_s8 + $0x8] sm:$0xff] %v1119_v34  ;;  %v1295_v1 = vpop.f32.mrb[43].mxu1 }
 0xbb8   :  { %1130 = vsyncpa [#allocation4], 1 }
 0xbb9   :  { %1131 = vsyncpa [#allocation6], 1 }

</bundles_post_ra>
